<compile_context>
chip_gen: v6e
topology: v6e:2x2x1
jax: 0.10.0
libtpu: 0.0.40
codegen_flags: <defaults>
</compile_context>

<pallas_src>
import functools

import jax
import jax.numpy as jnp
import numpy as np
from jax import lax
from jax.experimental import pallas as pl
from jax.experimental.pallas import tpu as pltpu


# ----------------------------------------------------------------------------
# Fused kernel: one grid step = one batch element.
#   x_ref    : (1, T, C)
#   wqkv_ref : (C, 3*H*Dh)   bqkv_ref : (1, 3*H*Dh)
#   wo_ref   : (C, C)        bo_ref   : (1, C)
#   o_ref    : (1, T, C)
# ----------------------------------------------------------------------------
def fused_mha_kernel(x_ref, wqkv_ref, bqkv_ref, wo_ref, bo_ref, o_ref, *,
                     num_heads, head_dim):
    x = x_ref[0]                                                  # (T, C)
    T = x.shape[0]
    hdh = num_heads * head_dim

    # Single stacked projection for all heads' q, k, v: (T, C) @ (C, 3*H*Dh).
    qkv = jnp.dot(x, wqkv_ref[...], preferred_element_type=jnp.float32)
    qkv = qkv + bqkv_ref[...]                                     # (T, 3*H*Dh)

    # Causal (lower-triangular incl. diagonal) additive mask, built ONCE and
    # shared by every head (0 on allowed positions, -inf above the diagonal).
    row = lax.broadcasted_iota(jnp.int32, (T, T), 0)
    col = lax.broadcasted_iota(jnp.int32, (T, T), 1)
    mask_bias = jnp.where(row >= col, 0.0, -jnp.inf).astype(jnp.float32)
    scale = head_dim ** (-0.5)

    # Per-head attention. H is tiny and static -> fully unrolled; the q/k/v
    # slices are static lane-column windows of the VMEM-resident qkv tile,
    # so no extra DMAs and no relayouts.
    outs = []
    for h in range(num_heads):
        q = qkv[:, h * head_dim:(h + 1) * head_dim] * scale       # (T, Dh)
        k = qkv[:, hdh + h * head_dim: hdh + (h + 1) * head_dim]  # (T, Dh)
        v = qkv[:, 2 * hdh + h * head_dim:
                   2 * hdh + (h + 1) * head_dim]                  # (T, Dh)

        s = jnp.dot(q, k.T, preferred_element_type=jnp.float32)   # (T, T)
        s = s + mask_bias

        # Numerically stable softmax; the divide runs on the EUP via the
        # approximate reciprocal (its own bundle slot -> effectively free).
        m = jnp.max(s, axis=-1, keepdims=True)
        p = jnp.exp(s - m)
        denom = jnp.sum(p, axis=-1, keepdims=True)
        p = p * pl.reciprocal(denom, approx=True)

        # TODO(synk): nn.Dropout(p=0.2) on the attention weights is identity
        # in eval mode; train-mode RNG dropout is not reproduced here.

        outs.append(jnp.dot(p, v, preferred_element_type=jnp.float32))

    # Concat(head_1, ..., head_H) along features, then the final linear
    # projection, stored as one contiguous (T, C) slab.
    cat = jnp.concatenate(outs, axis=-1)                          # (T, H*Dh)
    y = jnp.dot(cat, wo_ref[...], preferred_element_type=jnp.float32)
    y = y + bo_ref[...]
    o_ref[0] = y.astype(o_ref.dtype)

    # TODO(synk): for realistic T (>= a few hundred) switch to a KV-tiled
    # flash-style online softmax and bf16 MXU inputs; unnecessary at toy sizes.


def pack_qkv(wq, bq, wk, bk, wv, bv):
    """Stack per-head weights (H, C, Dh) / biases (H, Dh) into one
    (C, 3*H*Dh) weight and (1, 3*H*Dh) bias with head-major column blocks."""
    H, C, Dh = wq.shape

    def flat_w(w):   # (H, C, Dh) -> (C, H*Dh); columns [h*Dh:(h+1)*Dh] = head h
        return jnp.transpose(w, (1, 0, 2)).reshape(C, H * Dh)

    def flat_b(b):   # (H, Dh) -> (1, H*Dh)
        return b.reshape(1, H * Dh)

    wqkv = jnp.concatenate([flat_w(wq), flat_w(wk), flat_w(wv)], axis=1)
    bqkv = jnp.concatenate([flat_b(bq), flat_b(bk), flat_b(bv)], axis=1)
    return wqkv, bqkv


def multi_head_attention(x, wqkv, bqkv, wo, bo, *, num_heads):
    """x: (B, T, C); wqkv: (C, 3*H*Dh); bqkv: (1, 3*H*Dh);
    wo: (C, C) (in, out); bo: (1, C). Returns (B, T, C)."""
    B, T, C = x.shape
    head_dim = C // num_heads
    qkv_cols = wqkv.shape[1]

    kernel = functools.partial(fused_mha_kernel,
                               num_heads=num_heads, head_dim=head_dim)

    return pl.pallas_call(
        kernel,
        out_shape=jax.ShapeDtypeStruct((B, T, C), jnp.float32),
        grid_spec=pltpu.PrefetchScalarGridSpec(
            num_scalar_prefetch=0,
            grid=(B,),
            in_specs=[
                pl.BlockSpec((1, T, C), lambda b: (b, 0, 0)),        # x
                pl.BlockSpec((C, qkv_cols), lambda b: (0, 0)),       # Wqkv
                pl.BlockSpec((1, qkv_cols), lambda b: (0, 0)),       # bqkv
                pl.BlockSpec((C, C), lambda b: (0, 0)),              # Wo
                pl.BlockSpec((1, C), lambda b: (0, 0)),              # bo
            ],
            out_specs=pl.BlockSpec((1, T, C), lambda b: (b, 0, 0)),
        ),
        compiler_params=pltpu.CompilerParams(
            dimension_semantics=("parallel",)),
    )(x, wqkv, bqkv, wo, bo)


def reference_mha(x, wq, bq, wk, bk, wv, bv, wo, bo):
    """Pure-JAX reference of MultiHeadAttentionBlock.forward (eval mode)."""
    B, T, C = x.shape
    H, _, Dh = wq.shape
    outs = []
    tril = jnp.tril(jnp.ones((T, T), jnp.float32))
    for h in range(H):
        q = x @ wq[h] + bq[h]
        k = x @ wk[h] + bk[h]
        v = x @ wv[h] + bv[h]
        wei = (q @ jnp.swapaxes(k, -2, -1)) * (Dh ** -0.5)
        wei = jnp.where(tril == 0, -jnp.inf, wei)
        wei = jax.nn.softmax(wei, axis=-1)
        outs.append(wei @ v)
    cat = jnp.concatenate(outs, axis=-1)
    return cat @ wo + bo


if __name__ == "__main__":
    # Shapes consistent with the module's forward:
    # embedding_dim=32, num_heads=4 (head_dim=8), context_size=8, batch=2.
    B, T, C, H = 2, 8, 32, 4
    Dh = C // H

    key = jax.random.PRNGKey(0)
    ks = jax.random.split(key, 10)
    bound = 1.0 / np.sqrt(C)  # torch.nn.Linear default init range

    x = jax.random.normal(ks[0], (B, T, C), jnp.float32)
    wq = jax.random.uniform(ks[1], (H, C, Dh), jnp.float32, -bound, bound)
    bq = jax.random.uniform(ks[2], (H, Dh), jnp.float32, -bound, bound)
    wk = jax.random.uniform(ks[3], (H, C, Dh), jnp.float32, -bound, bound)
    bk = jax.random.uniform(ks[4], (H, Dh), jnp.float32, -bound, bound)
    wv = jax.random.uniform(ks[5], (H, C, Dh), jnp.float32, -bound, bound)
    bv = jax.random.uniform(ks[6], (H, Dh), jnp.float32, -bound, bound)
    wo = jax.random.uniform(ks[7], (C, C), jnp.float32, -bound, bound)
    bo = jax.random.uniform(ks[8], (1, C), jnp.float32, -bound, bound)

    wqkv, bqkv = pack_qkv(wq, bq, wk, bk, wv, bv)

    out = multi_head_attention(x, wqkv, bqkv, wo, bo, num_heads=H)
    out = jax.block_until_ready(out)

    ref = reference_mha(x, wq, bq, wk, bk, wv, bv, wo, bo)
    # Tolerance relaxed slightly vs exact-divide softmax because the kernel
    # uses the EUP approximate reciprocal for the softmax normalization.
    np.testing.assert_allclose(np.asarray(out), np.asarray(ref),
                               rtol=2e-3, atol=2e-3)
    print("KERNEL_OK")
</pallas_src>

<mosaic_0001>
module attributes {stable_mosaic.version = 11 : i64} {
  func.func @fused_mha_kernel(%arg0: i32, %arg1: memref<1x8x32xf32, #tpu.memory_space<vmem>>, %arg2: memref<32x96xf32, #tpu.memory_space<vmem>>, %arg3: memref<1x96xf32, #tpu.memory_space<vmem>>, %arg4: memref<32x32xf32, #tpu.memory_space<vmem>>, %arg5: memref<1x32xf32, #tpu.memory_space<vmem>>, %arg6: memref<1x8x32xf32, #tpu.memory_space<vmem>>) attributes {dimension_semantics = [#tpu.dimension_semantics<parallel>], iteration_bounds = array<i64: 2>, scalar_prefetch = 0 : i64, scratch_operands = 0 : i64, tpu.core_type = #tpu.core_type<tc>, window_params = [{transform_indices = @transform_0, window_bounds = array<i64: 1, 8, 32>}, {pipeline_mode = #tpu.pipeline_mode<synchronous>, transform_indices = @transform_1, window_bounds = array<i64: 32, 96>}, {pipeline_mode = #tpu.pipeline_mode<synchronous>, transform_indices = @transform_2, window_bounds = array<i64: 1, 96>}, {pipeline_mode = #tpu.pipeline_mode<synchronous>, transform_indices = @transform_3, window_bounds = array<i64: 32, 32>}, {pipeline_mode = #tpu.pipeline_mode<synchronous>, transform_indices = @transform_4, window_bounds = array<i64: 1, 32>}, {transform_indices = @transform_5, window_bounds = array<i64: 1, 8, 32>}]} {
    %c0 = arith.constant 0 : index
    %c0_0 = arith.constant 0 : index
    %c0_1 = arith.constant 0 : index
    %0 = vector.load %arg1[%c0, %c0_0, %c0_1] : memref<1x8x32xf32, #tpu.memory_space<vmem>>, vector<1x8x32xf32>
    %1 = vector.shape_cast %0 : vector<1x8x32xf32> to vector<8x32xf32>
    %c0_2 = arith.constant 0 : index
    %c0_3 = arith.constant 0 : index
    %2 = vector.load %arg2[%c0_2, %c0_3] : memref<32x96xf32, #tpu.memory_space<vmem>>, vector<32x96xf32>
    %cst = arith.constant dense<0.000000e+00> : vector<8x96xf32>
    %3 = tpu.matmul %1, %2, %cst {dimension_numbers = #tpu.dot_dimension_numbers<[1], [0], [0], [1], [0, 0, 1, 1], [], []>} : vector<8x32xf32>, vector<32x96xf32>, vector<8x96xf32> -> vector<8x96xf32>
    %c0_4 = arith.constant 0 : index
    %c0_5 = arith.constant 0 : index
    %4 = vector.load %arg3[%c0_4, %c0_5] : memref<1x96xf32, #tpu.memory_space<vmem>>, vector<1x96xf32>
    %5 = vector.broadcast %4 : vector<1x96xf32> to vector<8x96xf32>
    %6 = arith.addf %3, %5 : vector<8x96xf32>
    %7 = tpu.iota {dimensions = array<i32: 0>} : vector<8x8xi32>
    %8 = tpu.iota {dimensions = array<i32: 1>} : vector<8x8xi32>
    %9 = arith.cmpi sge, %7, %8 : vector<8x8xi32>
    %cst_6 = arith.constant 0.000000e+00 : f32
    %cst_7 = arith.constant 0xFF800000 : f32
    %10 = vector.broadcast %cst_6 : f32 to vector<8x8xf32>
    %11 = vector.broadcast %cst_7 : f32 to vector<8x8xf32>
    %12 = arith.select %9, %10, %11 : vector<8x8xi1>, vector<8x8xf32>
    %13 = vector.extract_strided_slice %6 {offsets = [0, 0], sizes = [8, 8], strides = [1, 1]} : vector<8x96xf32> to vector<8x8xf32>
    %cst_8 = arith.constant 0.353553385 : f32
    %14 = vector.broadcast %cst_8 : f32 to vector<8x8xf32>
    %15 = arith.mulf %13, %14 : vector<8x8xf32>
    %16 = vector.extract_strided_slice %6 {offsets = [0, 32], sizes = [8, 8], strides = [1, 1]} : vector<8x96xf32> to vector<8x8xf32>
    %17 = vector.extract_strided_slice %6 {offsets = [0, 64], sizes = [8, 8], strides = [1, 1]} : vector<8x96xf32> to vector<8x8xf32>
    %18 = tpu.transpose %16, [1, 0] : vector<8x8xf32> -> vector<8x8xf32>
    %cst_9 = arith.constant dense<0.000000e+00> : vector<8x8xf32>
    %19 = tpu.matmul %15, %18, %cst_9 {dimension_numbers = #tpu.dot_dimension_numbers<[1], [0], [0], [1], [0, 0, 1, 1], [], []>} : vector<8x8xf32>, vector<8x8xf32>, vector<8x8xf32> -> vector<8x8xf32>
    %20 = arith.addf %19, %12 : vector<8x8xf32>
    %cst_10 = arith.constant dense<0xFF800000> : vector<8xf32>
    %21 = vector.multi_reduction <maximumf>, %20, %cst_10 [1] : vector<8x8xf32> to vector<8xf32>
    %22 = vector.shape_cast %21 : vector<8xf32> to vector<8x1xf32>
    %23 = vector.broadcast %22 : vector<8x1xf32> to vector<8x8xf32>
    %24 = arith.subf %20, %23 : vector<8x8xf32>
    %25 = math.exp %24 : vector<8x8xf32>
    %cst_11 = arith.constant dense<0.000000e+00> : vector<8xf32>
    %26 = vector.multi_reduction <add>, %25, %cst_11 [1] : vector<8x8xf32> to vector<8xf32>
    %27 = vector.shape_cast %26 : vector<8xf32> to vector<8x1xf32>
    %28 = tpu.reciprocal %27 {approx = true} : vector<8x1xf32> -> vector<8x1xf32>
    %29 = vector.broadcast %28 : vector<8x1xf32> to vector<8x8xf32>
    %30 = arith.mulf %25, %29 : vector<8x8xf32>
    %cst_12 = arith.constant dense<0.000000e+00> : vector<8x8xf32>
    %31 = tpu.matmul %30, %17, %cst_12 {dimension_numbers = #tpu.dot_dimension_numbers<[1], [0], [0], [1], [0, 0, 1, 1], [], []>} : vector<8x8xf32>, vector<8x8xf32>, vector<8x8xf32> -> vector<8x8xf32>
    %32 = vector.extract_strided_slice %6 {offsets = [0, 8], sizes = [8, 8], strides = [1, 1]} : vector<8x96xf32> to vector<8x8xf32>
    %cst_13 = arith.constant 0.353553385 : f32
    %33 = vector.broadcast %cst_13 : f32 to vector<8x8xf32>
    %34 = arith.mulf %32, %33 : vector<8x8xf32>
    %35 = vector.extract_strided_slice %6 {offsets = [0, 40], sizes = [8, 8], strides = [1, 1]} : vector<8x96xf32> to vector<8x8xf32>
    %36 = vector.extract_strided_slice %6 {offsets = [0, 72], sizes = [8, 8], strides = [1, 1]} : vector<8x96xf32> to vector<8x8xf32>
    %37 = tpu.transpose %35, [1, 0] : vector<8x8xf32> -> vector<8x8xf32>
    %cst_14 = arith.constant dense<0.000000e+00> : vector<8x8xf32>
    %38 = tpu.matmul %34, %37, %cst_14 {dimension_numbers = #tpu.dot_dimension_numbers<[1], [0], [0], [1], [0, 0, 1, 1], [], []>} : vector<8x8xf32>, vector<8x8xf32>, vector<8x8xf32> -> vector<8x8xf32>
    %39 = arith.addf %38, %12 : vector<8x8xf32>
    %cst_15 = arith.constant dense<0xFF800000> : vector<8xf32>
    %40 = vector.multi_reduction <maximumf>, %39, %cst_15 [1] : vector<8x8xf32> to vector<8xf32>
    %41 = vector.shape_cast %40 : vector<8xf32> to vector<8x1xf32>
    %42 = vector.broadcast %41 : vector<8x1xf32> to vector<8x8xf32>
    %43 = arith.subf %39, %42 : vector<8x8xf32>
    %44 = math.exp %43 : vector<8x8xf32>
    %cst_16 = arith.constant dense<0.000000e+00> : vector<8xf32>
    %45 = vector.multi_reduction <add>, %44, %cst_16 [1] : vector<8x8xf32> to vector<8xf32>
    %46 = vector.shape_cast %45 : vector<8xf32> to vector<8x1xf32>
    %47 = tpu.reciprocal %46 {approx = true} : vector<8x1xf32> -> vector<8x1xf32>
    %48 = vector.broadcast %47 : vector<8x1xf32> to vector<8x8xf32>
    %49 = arith.mulf %44, %48 : vector<8x8xf32>
    %cst_17 = arith.constant dense<0.000000e+00> : vector<8x8xf32>
    %50 = tpu.matmul %49, %36, %cst_17 {dimension_numbers = #tpu.dot_dimension_numbers<[1], [0], [0], [1], [0, 0, 1, 1], [], []>} : vector<8x8xf32>, vector<8x8xf32>, vector<8x8xf32> -> vector<8x8xf32>
    %51 = vector.extract_strided_slice %6 {offsets = [0, 16], sizes = [8, 8], strides = [1, 1]} : vector<8x96xf32> to vector<8x8xf32>
    %cst_18 = arith.constant 0.353553385 : f32
    %52 = vector.broadcast %cst_18 : f32 to vector<8x8xf32>
    %53 = arith.mulf %51, %52 : vector<8x8xf32>
    %54 = vector.extract_strided_slice %6 {offsets = [0, 48], sizes = [8, 8], strides = [1, 1]} : vector<8x96xf32> to vector<8x8xf32>
    %55 = vector.extract_strided_slice %6 {offsets = [0, 80], sizes = [8, 8], strides = [1, 1]} : vector<8x96xf32> to vector<8x8xf32>
    %56 = tpu.transpose %54, [1, 0] : vector<8x8xf32> -> vector<8x8xf32>
    %cst_19 = arith.constant dense<0.000000e+00> : vector<8x8xf32>
    %57 = tpu.matmul %53, %56, %cst_19 {dimension_numbers = #tpu.dot_dimension_numbers<[1], [0], [0], [1], [0, 0, 1, 1], [], []>} : vector<8x8xf32>, vector<8x8xf32>, vector<8x8xf32> -> vector<8x8xf32>
    %58 = arith.addf %57, %12 : vector<8x8xf32>
    %cst_20 = arith.constant dense<0xFF800000> : vector<8xf32>
    %59 = vector.multi_reduction <maximumf>, %58, %cst_20 [1] : vector<8x8xf32> to vector<8xf32>
    %60 = vector.shape_cast %59 : vector<8xf32> to vector<8x1xf32>
    %61 = vector.broadcast %60 : vector<8x1xf32> to vector<8x8xf32>
    %62 = arith.subf %58, %61 : vector<8x8xf32>
    %63 = math.exp %62 : vector<8x8xf32>
    %cst_21 = arith.constant dense<0.000000e+00> : vector<8xf32>
    %64 = vector.multi_reduction <add>, %63, %cst_21 [1] : vector<8x8xf32> to vector<8xf32>
    %65 = vector.shape_cast %64 : vector<8xf32> to vector<8x1xf32>
    %66 = tpu.reciprocal %65 {approx = true} : vector<8x1xf32> -> vector<8x1xf32>
    %67 = vector.broadcast %66 : vector<8x1xf32> to vector<8x8xf32>
    %68 = arith.mulf %63, %67 : vector<8x8xf32>
    %cst_22 = arith.constant dense<0.000000e+00> : vector<8x8xf32>
    %69 = tpu.matmul %68, %55, %cst_22 {dimension_numbers = #tpu.dot_dimension_numbers<[1], [0], [0], [1], [0, 0, 1, 1], [], []>} : vector<8x8xf32>, vector<8x8xf32>, vector<8x8xf32> -> vector<8x8xf32>
    %70 = vector.extract_strided_slice %6 {offsets = [0, 24], sizes = [8, 8], strides = [1, 1]} : vector<8x96xf32> to vector<8x8xf32>
    %cst_23 = arith.constant 0.353553385 : f32
    %71 = vector.broadcast %cst_23 : f32 to vector<8x8xf32>
    %72 = arith.mulf %70, %71 : vector<8x8xf32>
    %73 = vector.extract_strided_slice %6 {offsets = [0, 56], sizes = [8, 8], strides = [1, 1]} : vector<8x96xf32> to vector<8x8xf32>
    %74 = vector.extract_strided_slice %6 {offsets = [0, 88], sizes = [8, 8], strides = [1, 1]} : vector<8x96xf32> to vector<8x8xf32>
    %75 = tpu.transpose %73, [1, 0] : vector<8x8xf32> -> vector<8x8xf32>
    %cst_24 = arith.constant dense<0.000000e+00> : vector<8x8xf32>
    %76 = tpu.matmul %72, %75, %cst_24 {dimension_numbers = #tpu.dot_dimension_numbers<[1], [0], [0], [1], [0, 0, 1, 1], [], []>} : vector<8x8xf32>, vector<8x8xf32>, vector<8x8xf32> -> vector<8x8xf32>
    %77 = arith.addf %76, %12 : vector<8x8xf32>
    %cst_25 = arith.constant dense<0xFF800000> : vector<8xf32>
    %78 = vector.multi_reduction <maximumf>, %77, %cst_25 [1] : vector<8x8xf32> to vector<8xf32>
    %79 = vector.shape_cast %78 : vector<8xf32> to vector<8x1xf32>
    %80 = vector.broadcast %79 : vector<8x1xf32> to vector<8x8xf32>
    %81 = arith.subf %77, %80 : vector<8x8xf32>
    %82 = math.exp %81 : vector<8x8xf32>
    %cst_26 = arith.constant dense<0.000000e+00> : vector<8xf32>
    %83 = vector.multi_reduction <add>, %82, %cst_26 [1] : vector<8x8xf32> to vector<8xf32>
    %84 = vector.shape_cast %83 : vector<8xf32> to vector<8x1xf32>
    %85 = tpu.reciprocal %84 {approx = true} : vector<8x1xf32> -> vector<8x1xf32>
    %86 = vector.broadcast %85 : vector<8x1xf32> to vector<8x8xf32>
    %87 = arith.mulf %82, %86 : vector<8x8xf32>
    %cst_27 = arith.constant dense<0.000000e+00> : vector<8x8xf32>
    %88 = tpu.matmul %87, %74, %cst_27 {dimension_numbers = #tpu.dot_dimension_numbers<[1], [0], [0], [1], [0, 0, 1, 1], [], []>} : vector<8x8xf32>, vector<8x8xf32>, vector<8x8xf32> -> vector<8x8xf32>
    %89 = tpu.concatenate %31, %50, %69, %88 in 1 : vector<8x8xf32>, vector<8x8xf32>, vector<8x8xf32>, vector<8x8xf32> -> vector<8x32xf32>
    %c0_28 = arith.constant 0 : index
    %c0_29 = arith.constant 0 : index
    %90 = vector.load %arg4[%c0_28, %c0_29] : memref<32x32xf32, #tpu.memory_space<vmem>>, vector<32x32xf32>
    %cst_30 = arith.constant dense<0.000000e+00> : vector<8x32xf32>
    %91 = tpu.matmul %89, %90, %cst_30 {dimension_numbers = #tpu.dot_dimension_numbers<[1], [0], [0], [1], [0, 0, 1, 1], [], []>} : vector<8x32xf32>, vector<32x32xf32>, vector<8x32xf32> -> vector<8x32xf32>
    %c0_31 = arith.constant 0 : index
    %c0_32 = arith.constant 0 : index
    %92 = vector.load %arg5[%c0_31, %c0_32] : memref<1x32xf32, #tpu.memory_space<vmem>>, vector<1x32xf32>
    %93 = vector.broadcast %92 : vector<1x32xf32> to vector<8x32xf32>
    %94 = arith.addf %91, %93 : vector<8x32xf32>
    %c0_33 = arith.constant 0 : index
    %c0_34 = arith.constant 0 : index
    %c0_35 = arith.constant 0 : index
    %95 = vector.load %arg6[%c0_33, %c0_34, %c0_35] : memref<1x8x32xf32, #tpu.memory_space<vmem>>, vector<1x8x32xf32>
    %96 = vector.shape_cast %95 : vector<1x8x32xf32> to vector<8x32xf32>
    %97 = vector.shape_cast %94 : vector<8x32xf32> to vector<1x8x32xf32>
    tpu.vector_store %arg6[%c0_33, %c0_34, %c0_35], %97 {strides = array<i32>} : memref<1x8x32xf32, #tpu.memory_space<vmem>>, vector<1x8x32xf32>,
    return
  }
  func.func @transform_0(%arg0: i32) -> (i32, i32, i32) {
    %c0_i32 = arith.constant 0 : i32
    %c0_i32_0 = arith.constant 0 : i32
    %c0_i32_1 = arith.constant 0 : i32
    return %arg0, %c0_i32, %c0_i32_0 : i32, i32, i32
  }
  func.func @transform_1(%arg0: i32) -> (i32, i32) {
    %c0_i32 = arith.constant 0 : i32
    %c0_i32_0 = arith.constant 0 : i32
    %c0_i32_1 = arith.constant 0 : i32
    return %c0_i32, %c0_i32_0 : i32, i32
  }
  func.func @transform_2(%arg0: i32) -> (i32, i32) {
    %c0_i32 = arith.constant 0 : i32
    %c0_i32_0 = arith.constant 0 : i32
    %c0_i32_1 = arith.constant 0 : i32
    return %c0_i32, %c0_i32_0 : i32, i32
  }
  func.func @transform_3(%arg0: i32) -> (i32, i32) {
    %c0_i32 = arith.constant 0 : i32
    %c0_i32_0 = arith.constant 0 : i32
    %c0_i32_1 = arith.constant 0 : i32
    return %c0_i32, %c0_i32_0 : i32, i32
  }
  func.func @transform_4(%arg0: i32) -> (i32, i32) {
    %c0_i32 = arith.constant 0 : i32
    %c0_i32_0 = arith.constant 0 : i32
    %c0_i32_1 = arith.constant 0 : i32
    return %c0_i32, %c0_i32_0 : i32, i32
  }
  func.func @transform_5(%arg0: i32) -> (i32, i32, i32) {
    %c0_i32 = arith.constant 0 : i32
    %c0_i32_0 = arith.constant 0 : i32
    %c0_i32_1 = arith.constant 0 : i32
    return %arg0, %c0_i32, %c0_i32_0 : i32, i32, i32
  }
}

</mosaic_0001>

<bundles_post_ra>
// kernel: tpu_custom_call.1
= control target key start
LH: loop header
LB: loop body
LE: loop exit
PB: predicated region body
PF: predicated region fallthrough
CT: control target
= control target key end

     0   :  { %10 = vsyncpa [#allocation3], 0  ;;  %s1908_s0 = inlined_call_operand.hbm [shape: f32[2,8,32], index: 0, kind: input, shape index: {}]   ;;  %s1909_s1 = inlined_call_operand.hbm [shape: f32[32,96], index: 1, kind: input, shape index: {}]   ;;  %s1910_s2 = inlined_call_operand.vmem [shape: f32[1,96], index: 2, kind: input, shape index: {}]   ;;  %s1911_s3 = inlined_call_operand.hbm [shape: f32[32,32], index: 3, kind: input, shape index: {}]   ;;  %s1912_s4 = inlined_call_operand.vmem [shape: f32[1,32], index: 4, kind: input, shape index: {}]   ;;  %s1913_s5 = inlined_call_operand.hbm [shape: f32[2,8,32], index: 5, kind: output, shape index: {}]  }
   0x1   :  { %12 = vsyncpa [#allocation3 + $0x1], 0 }
   0x2   :  { %13 = vsyncpa [#allocation6], 0 }
   0x3   :  { %14 = vsyncpa [#allocation4], 0 }
   0x4   :  { %16 = vsyncpa [#allocation4 + $0x1], 0  ;;  %s1653_s18 = smov 0   ;;  %s1655_s19 = smov 0  }
   0x5   :  { %s1657_s20 = smov 0   ;;  %s1659_s21 = smov 0  }
   0x6 LB: > { %s1674_s22 = sadd.s32 4294967295, %s1598_s21   ;;  %s1228_s23 = sadd.s32 4294967294, %s1598_s21   ;;  %s1598_s21 = sphi %s1659_s21, %s1935_s21   ;;  %s1594_s20 = sphi %s1657_s20, %s1934_s20   ;;  %s1590_s19 = sphi %s1655_s19, %s1933_s19   ;;  %s1586_s18 = sphi %s1653_s18, %s1932_s18  }
   0x7   : > { %p42_p0 = scmp.ne.s32.totalorder %s1590_s19, %s1586_s18  ;;  %p1914_p1 = scmp.eq.s32.totalorder %s1674_s22, 0 }
   0x8   : > { %p156_p3 = scmp.eq.s32.totalorder %s1228_s23, 1  ;;  %p1229_p5 = scmp.ge.s32.totalorder %s1598_s21, 1 }
   0x9   : > { %p1683_p4 = por %p1914_p1, %p42_p0  ;;  %p163_p7 = scmp.lt.s32.totalorder %s1598_s21, 3 }
   0xa   : > { %p1688_p6 = por %p156_p3, %p42_p0  ;;  %s1600_s27 = smov [#allocation5]  }
   0xb   : > { %s1918_s24 = scalar_select %p1683_p4, 1, 0 }
   0xc   : > { %s1919_s25 = scalar_select %p1688_p6, 1, 0 }
   0xd   : > { %p1693_p8 = pnand %p1229_p5, %p163_p7  ;;  %s175_s28 = sshll.u32 %s1600_s27, 4  ;;  %s176_s28 = int_to_ptr.vmem [resolvable:$true] %s175_s28 }
   0xe   : > { %s1601_s30 = smov [#allocation7]   ;;  %s1461_s7 = scalar_lea.vmem %s176_s28, 512 }
   0xf   : > { %s1920_s26 = scalar_select %p1693_p8, 1, 0 }
  0x10   : > { %p1360_p9 = pneg %p1693_p8  ;;  %s191_s6 = sshll.u32 %s1601_s30, 4  ;;  %s192_s6 = int_to_ptr.vmem [resolvable:$true] %s191_s6 }
  0x11   : > { %p1462_p13 = scmp.ne.s32.totalorder %s176_s28, %s1461_s7  ;;  %p1469_p5 = scmp.lt.s32.totalorder %s176_s28, %s176_s28 }
  0x12   : > { %p1702_p11 = pnand %p1360_p9, %p1914_p1  ;;  %p1470_p7 = scmp.lt.s32.totalorder %s1461_s7, %s1461_s7 }
  0x14   : > { %p1452_p12 = pneg %p1702_p11  ;;  %p1471_p10 = por %p1470_p7, %p1469_p5 }
  0x16   : > { %p1464_p0 = pnand %p1462_p13, %p1452_p12 }
  0x18   : > { %p1465_p3 = pneg %p1464_p0 }
  0x1a   : > { %p1472_p9 = pnand %p1471_p10, %p1465_p3 }
  0x1c   : > { %1475 = shalt.err (!%p1472_p9)
}
  0x1d   : > { %s1602_s8 = smov 128   ;;  %s1603_s9 = smov 8  }
  0x1e   : > { %1363 = dma.hbm_to_vmem [thread:$0]  (!%p1702_p11), %s1909_s1, 512, %s176_s28, [#allocation6], %s1602_s8, %s1602_s8, %s1603_s9  }
  0x1f   : > { %s1487_s12 = scalar_lea.vmem %s192_s6, 512  ;;  %p1495_p2 = scmp.lt.s32.totalorder %s192_s6, %s192_s6 }
  0x20   : > { %p1488_p1 = scmp.ne.s32.totalorder %s192_s6, %s1487_s12  ;;  %p1496_p6 = scmp.lt.s32.totalorder %s1487_s12, %s1487_s12 }
  0x22   : > { %p1490_p13 = pnand %p1488_p1, %p1452_p12  ;;  %p1497_p5 = por %p1496_p6, %p1495_p2 }
  0x24   : > { %p1491_p0 = pneg %p1490_p13 }
  0x26   : > { %p1498_p10 = pnand %p1497_p5, %p1491_p0 }
  0x28   : > { %1501 = shalt.err (!%p1498_p10)
}
  0x29   : > { %1366 = dma.hbm_to_vmem [thread:$0]  (!%p1702_p11), %s1911_s3, 512, %s192_s6, [#allocation6], %s1602_s8, %s1602_s8, %s1603_s9  }
  0x2a   : > { %s1725_s15 = sadd.s32 1, %s1598_s21   ;;  %s29_s16 = sadd.s32 1, %s1594_s20 }
  0x2b   : > { %s26_s17 = ssub.s32 %s1598_s21, %s1725_s15  ;;  %p36_p1 = scmp.ne.s32.totalorder %s1594_s20, %s1590_s19 }
  0x2c   : > { %p27_p2 = scmp.eq.s32.totalorder %s26_s17, 0  ;;  %p37_p6 = scmp.eq.s32.totalorder %s1598_s21, 0 }
  0x2d   : > { %p1922_p12 = scmp.eq.s32.totalorder %s1674_s22, 1  ;;  %p1377_p7 = scmp.lt.s32.totalorder %s1598_s21, 2 }
  0x2e   : > { %s1741_s27 = scalar_select %p27_p2, %s1594_s20, %s29_s16  }
  0x2f   : > { %p1735_p3 = por %p1922_p12, %p36_p1  ;;  %p38_p9 = por %p37_p6, %p36_p1 }
  0x30   : > { %s208_s28 = sand.u32 1, %s1594_s20   ;;  %s1234_s30 = sshll.u32 %s1598_s21, 7 }
  0x31   : > { %s1923_s23 = scalar_select %p1735_p3, 1, 0 }
  0x32   : > { %s1233_s29 = sshll.u32 %s208_s28, 3  ;;  %s1748_s8 = scalar_lea.hbm %s1908_s0, %s1234_s30 }
  0x33   : > { %s212_s9 = scalar_lea.vmem [#allocation2], %s1233_s29  ;;  %p1750_p11 = pnand %p1377_p7, %p38_p9 }
  0x34   : > { %s219_s10 = sshll.u32 %s212_s9, 4  ;;  %s209_s12 = scalar_lea.sflag [#allocation3], %s208_s28  ;;  %s220_s10 = int_to_ptr.vmem [resolvable:$true] %s219_s10 }
  0x35   : > { %s1502_s13 = scalar_lea.hbm %s1748_s8, 128  ;;  %p1504_p0 = pneg %p1750_p11 }
  0x36   : > { %p1503_p13 = scmp.ne.s32.totalorder %s1748_s8, %s1502_s13  ;;  %s1507_s17 = scalar_lea.hbm %s1908_s0, 256 }
  0x37   : > { %p1508_p1 = scmp.lt.s32.totalorder %s1748_s8, %s1908_s0  ;;  %p1509_p2 = scmp.lt.s32.totalorder %s1507_s17, %s1502_s13 }
  0x38   : > { %p1505_p5 = pnand %p1504_p0, %p1503_p13 }
  0x39   : > { %p1510_p6 = por %p1509_p2, %p1508_p1 }
  0x3a   : > { %p1506_p10 = pneg %p1505_p5 }
  0x3c   : > { %p1511_p12 = pnand %p1510_p6, %p1506_p10 }
  0x3e   : > { %1514 = shalt.err (!%p1511_p12)
}
  0x3f   : > { %s1515_s6 = scalar_lea.vmem %s220_s10, 128  ;;  %s1604_s28 = smov [#allocation2]  }
  0x40   : > { %p1516_p7 = scmp.ne.s32.totalorder %s220_s10, %s1515_s6  ;;  %s1520_s7 = sshll.u32 %s1604_s28, 4  ;;  %s1521_s7 = int_to_ptr.vmem [resolvable:$false] %s1520_s7 }
  0x41   : > { %s1522_s9 = scalar_lea.vmem %s1521_s7, 256  ;;  %p1523_p13 = scmp.lt.s32.totalorder %s220_s10, %s1521_s7 }
  0x42   : > { %p1518_p9 = pnand %p1516_p7, %p1504_p0  ;;  %p1524_p5 = scmp.lt.s32.totalorder %s1522_s9, %s1515_s6 }
  0x44   : > { %p1519_p3 = pneg %p1518_p9  ;;  %p1525_p4 = por %p1524_p5, %p1523_p13 }
  0x46   : > { %p1526_p8 = pnand %p1525_p4, %p1519_p3 }
  0x48   : > { %1529 = shalt.err (!%p1526_p8)
}
  0x49   : > { %1370 = dma.hbm_to_vmem [thread:$0]  (!%p1750_p11), %s1748_s8, 128, %s220_s10, %s209_s12  }
  0x4a   : > { %p1925_p10 = scmp.ne.s32.totalorder %s1920_s26, 0 }
  0x4b   : > { %s1771_s13 = sand.u32 (!%p1925_p10), 1, %s1590_s19   ;;  %p1926_p4 = scmp.ne.s32.totalorder (!%p1925_p10), %s1918_s24, 0 }
  0x4c   : > { %228 = sbr.rel (%p1925_p10) target bundleno = 1988 (0x7c4), region = 40  ;;  %s1236_s14 = sshll.u32 (!%p1925_p10), %s1771_s13, 3 }
  0x4d   : > { %s231_s16 = scalar_lea.sflag (!%p1925_p10), [#allocation3], %s1771_s13  ;;  %s234_s17 = scalar_lea.vmem (!%p1925_p10), [#allocation2], %s1236_s14 }
  0x51   : > { %1573 = dma.done.wait (%p1926_p4), %s231_s16, 128  }
  0x52   : > { %1575 = vsyncadd (%p1926_p4), %s231_s16, 4294967168  ;;  %p1927_p8 = scmp.eq.s32.totalorder %s1674_s22, 0 }
  0x54   : > { %1577 = dma.done.wait (%p1927_p8), [#allocation6], 1024   ;;  %p1928_p3 = pmov %p1927_p8 }
  0x55   : > { %v1605_v0 = vmov 0.0   ;;  %vm1606_vm0 = vmmov 0   ;;  %v273_v1 = vld [vmem:[#allocation5 + $0x18] sm:$0xff]  ;;  %v272_v2 = vld [vmem:[#allocation5 + $0x10] sm:$0xff]  ;;  %v271_v3 = vld [vmem:[#allocation5 + $0x8] sm:$0xff]  ;;  %vm281_vm1 = vcmask 261120   ;;  %v355_v16 = vlaneseq }
  0x56   : > { %1579 = vsyncadd (%p1928_p3), [#allocation6], 4294966272  ;;  %1286 = vmatprep.subr.mxu0 %v1605_v0  ;;  %1294 = vmatprep.mubr.msk.f32.mxu0 %vm1606_vm0, %v1605_v0  ;;  %v270_v4 = vld [vmem:[#allocation5] sm:$0xff]  ;;  %v269_v5 = vld [vmem:[%s234_s17] sm:$0xff]  ;;  %s1607_s8 = smov 64   ;;  %s1608_s10 = smov 96  }
  0x57   : > { %1297 = vmatprep.subr.mxu1 %v1605_v0  ;;  %1299 = vmatprep.mubr.msk.f32.mxu1 %vm1606_vm0, %v1605_v0  ;;  %v1240_v6 = vld [vmem:[%s1910_s2] ss:$0 sm:$0xff]  ;;  %s1609_s11 = smov 88   ;;  %s1610_s12 = smov 120   ;;  %vm365_vm2 = vcmask 64512   ;;  %v356_v17 = vshrl.u32 %v355_v16, 7 }
  0x58   : > { %1287 = vmatpush3.msra.mxu0 %v273_v1  ;;  %s1611_s30 = smov 80   ;;  %v358_v18 = vand.u32 127, %v355_v16  ;;  %v1612_v19 = vmov -inf   ;;  %s1613_s29 = smov 72   ;;  %v1041_v16 = vld [vmem:[#allocation7 + $0x8] sm:$0xff]  ;;  %vm1036_vm4 = vcmask 130048  }
  0x59   : > { %1288 = vmatprep.subr.mxu0 %v1605_v0  ;;  %s1614_s6 = smov 112   ;;  %s1615_s28 = smov 104   ;;  %vm1038_vm5 = vcmask 195584  }
  0x5a   : > { %1289 = vmatpush3.msra.mxu0 %v272_v2  ;;  %vm359_vm3 = vcmp.ge.s32.totalorder %v356_v17, %v358_v18  ;;  %s1616_s7 = smov 56   ;;  %s1617_s9 = smov 48   ;;  %v1040_v17 = vld [vmem:[#allocation7] sm:$0xff] }
  0x5b   : > { %1290 = vmatprep.subr.mxu0 %v1605_v0  ;;  %v360_v20 = vsel %vm359_vm3, 0.0, %v1612_v19  ;;  %s1618_s16 = smov 40   ;;  %s1619_s17 = smov 8  }
  0x5c   : > { %1291 = vmatpush3.msra.mxu0 %v271_v3  ;;  %s1620_s24 = smov 16   ;;  %s1621_s26 = smov 24  }
  0x5d   : > { %1292 = vmatprep.subr.mxu0 %v1605_v0  ;;  %p1929_p0 = scmp.ne.s32.totalorder %s1923_s23, 0 }
  0x5e   : > { %1293 = vmatpush3.msra.mxu0 %v270_v4 }
  0x5f   : > { %1295 = vmatmul.mubr.msk.f32.vlgmr.msra.gmra.mxu0 %vm281_vm1, %v269_v5  ;;  %1317 = vmatprep.subr.mxu0 %v1605_v0 }
  0x60   : > { %1319 = vmatprep.mubr.msk.f32.mxu0 %vm1606_vm0, %v1605_v0 }
 0x11f   : > { %v351_v7 = vpop.f32.mrf.mxu0 }
 0x120   : > { %v1801_v8 = vadd.f32 %v1240_v6, %v351_v7 }
 0x121   : > { %v1296_v9 = vpop.f32.mrf.mxu0 }
 0x122   : > { %452 = vrot.lane.b32.xlu1 %v1801_v8, %s1607_s8  ;;  %363 = vrot.lane.b32.xlu0 %v1801_v8, %s1608_s10  ;;  %v361_v10 = vmul.f32 0.35355338, %v1801_v8 }
 0x126   : > { %530 = vrot.lane.b32.xlu1 %v1801_v8, %s1609_s11  ;;  %s1257_s11 = sshll.u32 %s1674_s22, 7  ;;  %s1622_s22 = smov [#allocation8]  }
 0x12a   : > { %528 = vrot.lane.b32.xlu1 %v361_v10, %s1610_s12  ;;  %s268_s12 = scalar_lea.vmem [#allocation8], %s1236_s14  ;;  %s1534_s14 = sshll.u32 %s1622_s22, 4  ;;  %s1535_s14 = int_to_ptr.vmem [resolvable:$false] %s1534_s14 }
 0x12e   : > { %695 = vrot.lane.b32.xlu1 %v1801_v8, %s1611_s30  ;;  %s1139_s30 = sshll.u32 %s268_s12, 4  ;;  %s1140_s30 = int_to_ptr.vmem [resolvable:$true] %s1139_s30 }
 0x12f   : > { %p1537_p6 = scmp.lt.s32.totalorder %s1140_s30, %s1535_s14 }
 0x194   : > { %v453_v11 = vpop.permute.xlu1 %452  ;;  %v364_v12 = vpop.permute.xlu0 %363 }
 0x195   : > { %1298 = vmatpush3.xpose.msk.msra.mxu1 %vm365_vm2, %v364_v12 }
 0x196   : > { %1302 = vmatprep.subr.mxu1 %v1605_v0 }
 0x198   : > { %v531_v13 = vpop.permute.xlu1 %530  ;;  %1300 = vmatmul.mubr.msk.f32.vlgmr.msra.gmra.mxu1 %vm365_vm2, %v361_v10 }
 0x199   : > { %1303 = vmatpush3.msra.mxu1 %v453_v11  ;;  %1304 = vmatprep.mubr.msk.f32.mxu1 %vm1606_vm0, %v1605_v0 }
 0x19a   : > { %1307 = vmatprep.subr.mxu1 %v1605_v0 }
 0x19c   : > { %v529_v14 = vpop.permute.xlu1 %528 }
 0x1a0   : > { %v696_v15 = vpop.permute.xlu1 %695 }
 0x1a1   : > { %1318 = vmatpush3.xpose.msk.msra.mxu0 %vm365_vm2, %v696_v15  ;;  %v1042_v15 = vld [vmem:[#allocation7 + $0x10] sm:$0xff] }
 0x1a2   : > { %1327 = vmatprep.subr.mxu0 %v1605_v0 }
 0x258   : > { %v437_v21 = vpop.f32.mrf.mxu1 }
 0x259   : > { %v438_v22 = vadd.f32 %v437_v21, %v360_v20 }
 0x25a   : > { %v1301_v23 = vpop.f32.mrf.mxu1 }
 0x25b   : > { %v441_v24 = vsel %vm365_vm2, %v438_v22, -inf }
 0x25c   : > { %442 = vmax.xlane.f32.xlu0 %v441_v24 }
 0x272   : > { %860 = vrot.lane.b32.xlu0 %v1801_v8, %s1613_s29 }
 0x2e5   : > { %v443_v25 = vpop.xlane.xlu0 %442 }
 0x2e6   : > { %v444_v26 = vsub.f32 %v438_v22, %v443_v25 }
 0x2e8   : > { %v445_v27 = vmul.f32 1.442695, %v444_v26 }
 0x2e9   : > { %v861_v32 = vpop.permute.xlu0 %860 }
 0x2ea   : > { %1434 = vpow2.f32 %v445_v27 }
 0x2f7   : > { %v1435_v28 = vpop.eup %1434 }
 0x2f8   : > { %v447_v29 = vsel %vm365_vm2, %v1435_v28, 0.0 }
 0x2f9   : > { %448 = vadd.xlane.f32.xlu1 %v447_v29  ;;  %v1254_v29 = vld [vmem:[%s1912_s4] ss:$0 sm:$0xff] }
 0x30a   : > { %693 = vrot.lane.b32.xlu1 %v361_v10, %s1614_s6 }
 0x30e   : > { %858 = vrot.lane.b32.xlu1 %v361_v10, %s1615_s28  ;;  %s1870_s28 = scalar_lea.hbm %s1913_s5, %s1257_s11 }
 0x382   : > { %v449_v30 = vpop.xlane.xlu1 %448 }
 0x383   : > { %1436 = vrcp.f32 %v449_v30 }
 0x386   : > { %v694_v31 = vpop.permute.xlu1 %693 }
 0x387   : > { %1320 = vmatmul.mubr.msk.f32.vlgmr.msra.gmra.mxu0 %vm365_vm2, %v694_v31 }
 0x388   : > { %1328 = vmatpush3.xpose.msk.msra.mxu0 %vm365_vm2, %v861_v32  ;;  %1329 = vmatprep.mubr.msk.f32.mxu0 %vm1606_vm0, %v1605_v0 }
 0x389   : > { %1337 = vmatprep.subr.mxu0 %v1605_v0 }
 0x38a   : > { %v859_v33 = vpop.permute.xlu1 %858 }
 0x38b   : > { %1330 = vmatmul.mubr.msk.f32.vlgmr.msra.gmra.mxu0 %vm365_vm2, %v859_v33 }
 0x38c   : > { %1345 = vmatprep.mubr.msk.f32.mxu0 %vm1606_vm0, %v1605_v0 }
 0x390   : > { %v1437_v34 = vpop.eup %1436 }
 0x391   : > { %v451_v35 = vmul.f32 %v1437_v34, %v1435_v28 }
 0x393   : > { %1305 = vmatmul.mubr.msk.f32.vlgmr.msra.gmra.mxu1 %vm365_vm2, %v451_v35 }
 0x394   : > { %1308 = vmatpush3.xpose.msk.msra.mxu1 %vm365_vm2, %v531_v13  ;;  %1309 = vmatprep.mubr.msk.f32.mxu1 %vm1606_vm0, %v1605_v0 }
 0x395   : > { %1312 = vmatprep.subr.mxu1 %v1605_v0 }
 0x397   : > { %1310 = vmatmul.mubr.msk.f32.vlgmr.msra.gmra.mxu1 %vm365_vm2, %v529_v14  ;;  %v1043_v14 = vld [vmem:[#allocation7 + $0x18] sm:$0xff] }
 0x398   : > { %1314 = vmatprep.mubr.msk.f32.mxu1 %vm1606_vm0, %v1605_v0  ;;  %1338 = vmatpush3.msra.mxu0 %v1043_v14 }
 0x399   : > { %1339 = vmatprep.subr.mxu0 %v1605_v0 }
 0x39a   : > { %1340 = vmatpush3.msra.mxu0 %v1042_v15 }
 0x39b   : > { %1341 = vmatprep.subr.mxu0 %v1605_v0 }
 0x39c   : > { %1342 = vmatpush3.msra.mxu0 %v1041_v16 }
 0x39d   : > { %1343 = vmatprep.subr.mxu0 %v1605_v0 }
 0x39e   : > { %1344 = vmatpush3.msra.mxu0 %v1040_v17 }
 0x447   : > { %v767_v36 = vpop.f32.mrf.mxu0 }
 0x448   : > { %v768_v37 = vadd.f32 %v767_v36, %v360_v20 }
 0x449   : > { %v1321_v38 = vpop.f32.mrf.mxu0 }
 0x44a   : > { %v771_v39 = vsel %vm365_vm2, %v768_v37, -inf }
 0x44b   : > { %772 = vmax.xlane.f32.xlu0 %v771_v39  ;;  %v932_v40 = vpop.f32.mrf.mxu0 }
 0x44c   : > { %v933_v47 = vadd.f32 %v932_v40, %v360_v20 }
 0x44d   : > { %v1331_v41 = vpop.f32.mrf.mxu0 }
 0x44e   : > { %v936_v49 = vsel %vm365_vm2, %v933_v47, -inf }
 0x453   : > { %v1836_v42 = vpop.f32.mrf.mxu1 }
 0x455   : > { %v1306_v43 = vpop.f32.mrf.mxu1 }
 0x457   : > { %v602_v44 = vpop.f32.mrf.mxu1 }
 0x458   : > { %v603_v45 = vadd.f32 %v602_v44, %v360_v20 }
 0x459   : > { %v1311_v46 = vpop.f32.mrf.mxu1 }
 0x45a   : > { %v606_v48 = vsel %vm365_vm2, %v603_v45, -inf }
 0x45b   : > { %607 = vmax.xlane.f32.xlu1 %v606_v48 }
 0x45f   : > { %937 = vmax.xlane.f32.xlu1 %v936_v49 }
 0x4d4   : > { %v773_v50 = vpop.xlane.xlu0 %772 }
 0x4d5   : > { %v774_v51 = vsub.f32 %v768_v37, %v773_v50 }
 0x4d7   : > { %v775_v52 = vmul.f32 1.442695, %v774_v51 }
 0x4d9   : > { %1438 = vpow2.f32 %v775_v52 }
 0x4e4   : > { %v608_v53 = vpop.xlane.xlu1 %607 }
 0x4e5   : > { %v609_v61 = vsub.f32 %v603_v45, %v608_v53 }
 0x4e6   : > { %v1439_v54 = vpop.eup %1438 }
 0x4e7   : > { %v777_v55 = vsel %vm365_vm2, %v1439_v54, 0.0  ;;  %v610_v62 = vmul.f32 1.442695, %v609_v61 }
 0x4e8   : > { %778 = vadd.xlane.f32.xlu1 %v777_v55  ;;  %v938_v56 = vpop.xlane.xlu1 %937 }
 0x4e9   : > { %v939_v57 = vsub.f32 %v933_v47, %v938_v56 }
 0x4eb   : > { %v940_v58 = vmul.f32 1.442695, %v939_v57 }
 0x4ed   : > { %1440 = vpow2.f32 %v940_v58 }
 0x4ee   : > { %1442 = vpow2.f32 %v610_v62 }
 0x4f9   : > { %617 = vrot.lane.b32.xlu1 %v1801_v8, %s1616_s7  ;;  %s1126_s7 = scalar_lea.sflag [#allocation4], %s1771_s13 }
 0x4fa   : > { %v1441_v59 = vpop.eup %1440 }
 0x4fb   : > { %v942_v60 = vsel %vm365_vm2, %v1441_v59, 0.0  ;;  %v1443_v63 = vpop.eup %1442 }
 0x4fc   : > { %943 = vadd.xlane.f32.xlu0 %v942_v60  ;;  %v612_v1 = vsel %vm365_vm2, %v1443_v63, 0.0 }
 0x512   : > { %782 = vrot.lane.b32.xlu0 %v1801_v8, %s1617_s9  ;;  %s1530_s9 = scalar_lea.vmem %s1140_s30, 128 }
 0x513   : > { %p1531_p11 = scmp.ne.s32.totalorder %s1140_s30, %s1530_s9 }
 0x515   : > { %p1532_p1 = pnand %p1531_p11, %p1929_p0 }
 0x517   : > { %p1533_p2 = pneg %p1532_p1 }
 0x51d   : > { %613 = vadd.xlane.f32.xlu1 %v612_v1 }
 0x52e   : > { %947 = vrot.lane.b32.xlu1 %v1801_v8, %s1618_s16  ;;  %s1536_s16 = scalar_lea.vmem %s1535_s14, 256 }
 0x52f   : > { %p1538_p12 = scmp.lt.s32.totalorder %s1536_s16, %s1530_s9 }
 0x531   : > { %p1539_p7 = por %p1538_p12, %p1537_p6 }
 0x533   : > { %p1540_p9 = pnand %p1539_p7, %p1533_p2 }
 0x571   : > { %v779_v2 = vpop.xlane.xlu1 %778 }
 0x575   : > { %v618_v3 = vpop.permute.xlu1 %617 }
 0x576   : > { %1313 = vmatpush3.msra.mxu1 %v618_v3 }
 0x577   : > { %1322 = vmatprep.subr.mxu1 %v1605_v0 }
 0x585   : > { %v944_v5 = vpop.xlane.xlu0 %943 }
 0x589   : > { %v783_v10 = vpop.permute.xlu0 %782 }
 0x5a6   : > { %v614_v4 = vpop.xlane.xlu1 %613 }
 0x5a7   : > { %1444 = vrcp.f32 %v614_v4 }
 0x5a8   : > { %1446 = vrcp.f32 %v779_v2 }
 0x5a9   : > { %1448 = vrcp.f32 %v944_v5 }
 0x5aa   : > { %v948_v12 = vpop.permute.xlu1 %947 }
 0x5b4   : > { %v1445_v6 = vpop.eup %1444 }
 0x5b5   : > { %v616_v7 = vmul.f32 %v1445_v6, %v1443_v63  ;;  %v1447_v9 = vpop.eup %1446 }
 0x5b6   : > { %v781_v8 = vmul.f32 %v1447_v9, %v1439_v54  ;;  %v1449_v11 = vpop.eup %1448 }
 0x5b7   : > { %1315 = vmatmul.mubr.msk.f32.vlgmr.msra.gmra.mxu1 %vm365_vm2, %v616_v7  ;;  %v946_v13 = vmul.f32 %v1449_v11, %v1441_v59 }
 0x5b8   : > { %1323 = vmatpush3.msra.mxu1 %v783_v10  ;;  %1324 = vmatprep.mubr.msk.f32.mxu1 %vm1606_vm0, %v1605_v0 }
 0x5b9   : > { %1332 = vmatprep.subr.mxu1 %v1605_v0 }
 0x5bb   : > { %1325 = vmatmul.mubr.msk.f32.vlgmr.msra.gmra.mxu1 %vm365_vm2, %v781_v8 }
 0x5bc   : > { %1333 = vmatpush3.msra.mxu1 %v948_v12  ;;  %1334 = vmatprep.mubr.msk.f32.mxu1 %vm1606_vm0, %v1605_v0 }
 0x5bf   : > { %1335 = vmatmul.mubr.msk.f32.vlgmr.msra.gmra.mxu1 %vm365_vm2, %v946_v13 }
 0x677   : > { %v689_v18 = vpop.f32.mrf.mxu1 }
 0x678   : > { %1024 = vrot.lane.b32.xlu1 %v689_v18, %s1619_s17 }
 0x679   : > { %v1316_v19 = vpop.f32.mrf.mxu1 }
 0x67b   : > { %v854_v20 = vpop.f32.mrf.mxu1 }
 0x67c   : > { %1028 = vrot.lane.b32.xlu0 %v854_v20, %s1620_s24 }
 0x67d   : > { %v1326_v21 = vpop.f32.mrf.mxu1 }
 0x67f   : > { %v1019_v22 = vpop.f32.mrf.mxu1 }
 0x680   : > { %1032 = vrot.lane.b32.xlu1 %v1019_v22, %s1621_s26 }
 0x681   : > { %v1336_v23 = vpop.f32.mrf.mxu1 }
 0x6ea   : > { %v1025_v24 = vpop.permute.xlu1 %1024 }
 0x6eb   : > { %v1035_v0 = vsel %vm365_vm2, %v1836_v42, %v1025_v24 }
 0x6ee   : > { %v1029_v25 = vpop.permute.xlu0 %1028 }
 0x6ef   : > { %v1037_v26 = vsel %vm1036_vm4, %v1035_v0, %v1029_v25 }
 0x6f2   : > { %v1033_v27 = vpop.permute.xlu1 %1032 }
 0x6f3   : > { %v1039_v28 = vsel %vm1038_vm5, %v1037_v26, %v1033_v27 }
 0x6f4   : > { %1346 = vmatmul.mubr.msk.f32.vlgmr.msra.gmra.mxu0 %vm281_vm1, %v1039_v28 }
 0x7b4   : > { %v1120_v30 = vpop.f32.mrf.mxu0 }
 0x7b5   : > { %v1121_v31 = vadd.f32 %v1254_v29, %v1120_v30 }
 0x7b6   : > { %v1347_v32 = vpop.f32.mrf.mxu0 }
 0x7b7   : > { %1124 = vst.msk [vmem:[%s268_s12] sm:$0xff] %vm281_vm1, %v1121_v31 }
 0x7b8   : > { %1543 = shalt.err (!%p1540_p9)
}
 0x7b9   : > { %s1544_s17 = scalar_lea.hbm %s1870_s28, 128  ;;  %s1548_s26 = scalar_lea.hbm %s1913_s5, 256 }
 0x7ba   : > { %p1545_p13 = scmp.ne.s32.totalorder %s1870_s28, %s1544_s17  ;;  %p1549_p4 = scmp.lt.s32.totalorder %s1870_s28, %s1913_s5 }
 0x7bb   : > { %p1550_p8 = scmp.lt.s32.totalorder %s1548_s26, %s1544_s17 }
 0x7bc   : > { %p1546_p5 = pnand %p1545_p13, %p1929_p0 }
 0x7bd   : > { %p1551_p3 = por %p1550_p8, %p1549_p4 }
 0x7be   : > { %p1547_p10 = pneg %p1546_p5 }
 0x7c0   : > { %p1552_p11 = pnand %p1551_p3, %p1547_p10 }
 0x7c2   : > { %1555 = shalt.err (!%p1552_p11)
}
 0x7c3   : > { %1358 = dma.vmem_to_hbm [thread:$0]  (%p1929_p0), %s1140_s30, 128, %s1870_s28, %s1126_s7  }
 0x7c4 PF: > { %s1151_s11 = sand.u32 1, %s1586_s18   ;;  %p1930_p1 = scmp.ne.s32.totalorder %s1919_s25, 0 }
 0x7c5   : > { %p1931_p2 = scmp.ge.s32.totalorder %s1598_s21, 2  ;;  %s1152_s12 = scalar_lea.sflag [#allocation4], %s1151_s11 }
 0x7c7   : > { %p1372_p6 = pnand %p1931_p2, %p1930_p1 }
 0x7c9   : > { %p1373_p12 = pneg %p1372_p6 }
 0x7cb   : > { %1581 = dma.done.wait (%p1373_p12), %s1152_s12, 128  }
 0x7cc   : > { %1583 = vsyncadd (%p1373_p12), %s1152_s12, 4294967168  ;;  %p19_p7 = scmp.ge.s32.totalorder %s1725_s15, 4   ;;  %s1932_s18 = smov %s1590_s19 }
 0x7cd   : > { %s1933_s19 = smov %s1594_s20  ;;  %s1934_s20 = smov %s1741_s27 }
 0x7ce   : > { %s1935_s21 = smov %s1725_s15  ;;  %21 = sbr.rel (!%p19_p7) target bundleno = 6 (0x6), region = 93 }
 0x7d3   :  { %1157 = vsyncpa [#allocation3], 1 }
 0x7d4   :  { %1159 = vsyncpa [#allocation3 + $0x1], 1 }
 0x7d5   :  { %1160 = vsyncpa [#allocation6], 1 }
 0x7d6   :  { %1161 = vsyncpa [#allocation4], 1 }
 0x7d7   :  { %1163 = vsyncpa [#allocation4 + $0x1], 1 }

</bundles_post_ra>
